<compile_context>
chip_gen: v7x
topology: tpu7x:2x2x1
jax: 0.10.0
libtpu: 0.0.40
codegen_flags: <defaults>
</compile_context>

<pallas_src>
import jax
import jax.numpy as jnp
from jax.experimental import pallas as pl
from jax.experimental.pallas import tpu as pltpu


def _round_up(x, mult):
    return ((x + mult - 1) // mult) * mult


def _num_tensorcores():
    """Best-effort TensorCore count per chip (v7x has 2; v5e/v6e have 1)."""
    try:
        kind = jax.devices()[0].device_kind.lower()
    except Exception:
        return 1
    return 2 if ("v7" in kind or "7x" in kind) else 1


def _td_linear_kernel(x_ref, w_ref, b_ref, o_ref):
    # x_ref: (tm, f_in) streamed activations (input dtype)
    # w_ref: (f_in, f_out) resident weight, b_ref: (1, f_out) f32 resident bias.
    x = x_ref[...]
    w = w_ref[...]
    if x.dtype != w.dtype:
        # Opt-in reduced-precision streaming: cast in-kernel (the VPU slot has
        # huge slack in this DMA-bound kernel) instead of a wrapper HBM pass.
        x = x.astype(w.dtype)
    acc = jnp.dot(x, w, preferred_element_type=jnp.float32)
    o_ref[...] = (acc + b_ref[...]).astype(o_ref.dtype)


def _run_matmul(x2d, weight, bias, *, tm, out_dtype, x_buffers, num_tc):
    m, f_in = x2d.shape
    f_out = weight.shape[1]

    # Sublane packing of the streamed operand: 16 rows for 16-bit, 8 for 32-bit.
    sub = 16 if jnp.dtype(x2d.dtype).itemsize == 2 else 8

    # Row tile: as large as requested, clamped so a 2-TensorCore chip (v7x) gets
    # at least 2 parallel grid steps.  Single-TC chips (v5e/v6e) are NOT split.
    limit = m if num_tc <= 1 else max(-(-m // num_tc), 1)
    tm_eff = max(sub, min(tm, _round_up(limit, sub)))
    grid = (pl.cdiv(m, tm_eff),)

    # True (unpadded) work -- f32 x/out by default, tiny resident weight/bias.
    xsize = jnp.dtype(x2d.dtype).itemsize
    wsize = jnp.dtype(weight.dtype).itemsize
    osize = jnp.dtype(out_dtype).itemsize
    cost = pl.CostEstimate(
        flops=2 * m * f_in * f_out,
        transcendentals=0,
        bytes_accessed=(m * f_in * xsize          # stream x once
                        + f_in * f_out * wsize    # weight (resident)
                        + f_out * 4               # bias (resident)
                        + m * f_out * osize),     # output written once
    )

    x_spec_kwargs = {}
    if x_buffers > 2:
        # Last-resort knob: only deepen buffering if a trace shows exposed DMA.
        x_spec_kwargs["pipeline_mode"] = pl.Buffered(x_buffers)

    return pl.pallas_call(
        _td_linear_kernel,
        out_shape=jax.ShapeDtypeStruct((m, f_out), out_dtype),
        grid_spec=pltpu.PrefetchScalarGridSpec(
            num_scalar_prefetch=0,
            grid=grid,
            in_specs=[
                # Last dims equal the full array extents -> (8,128) rule is
                # satisfied without any zero padding.
                pl.BlockSpec((tm_eff, f_in), lambda i: (i, 0), **x_spec_kwargs),
                pl.BlockSpec((f_in, f_out), lambda i: (0, 0)),   # weight resident
                pl.BlockSpec((1, f_out), lambda i: (0, 0)),      # bias resident
            ],
            out_specs=pl.BlockSpec((tm_eff, f_out), lambda i: (i, 0)),
        ),
        compiler_params=pltpu.CompilerParams(
            dimension_semantics=("parallel",),
        ),
        cost_estimate=cost,
    )(x2d, weight, bias.astype(jnp.float32).reshape(1, f_out))


def time_distributed_linear(x, weight, bias, *, tm=8192,
                            compute_dtype=None,
                            out_dtype=None,
                            min_rows_for_kernel=4096,
                            force_kernel=False,
                            x_buffers=2):
    """Apply a Linear layer independently over the time axis (TimeDistributed).

    x:      (batch, seq, f_in), (N, f_in), or (f_in,) for the <=2-dim passthrough
    weight: (f_in, f_out)   (transposed vs. torch's (f_out, f_in))
    bias:   (f_out,)
    compute_dtype: None -> keep input dtype end-to-end (reference numerics);
                   jnp.bfloat16 -> opt-in reduced-precision streaming (x is cast
                   inside the kernel, accumulation stays f32).
    """
    f_in, f_out = weight.shape
    if out_dtype is None:
        out_dtype = x.dtype
    if compute_dtype is not None and weight.dtype != jnp.dtype(compute_dtype):
        weight = weight.astype(compute_dtype)   # tiny, one-time

    if x.ndim == 1:
        # nn.Linear on a bare vector (TimeDistributed <=2-dim passthrough).
        return (x @ weight + bias).astype(out_dtype)

    x2d = x if x.ndim == 2 else x.reshape(-1, f_in)
    m = x2d.shape[0]

    if m < min_rows_for_kernel and not force_kernel:
        # Tiny inputs: XLA's fused dot beats pallas_call launch + pipeline prologue.
        out2d = (x2d @ weight + bias).astype(out_dtype)
    else:
        out2d = _run_matmul(x2d, weight, bias, tm=tm, out_dtype=out_dtype,
                            x_buffers=x_buffers, num_tc=_num_tensorcores())

    if x.ndim == 2:
        return out2d
    return out2d.reshape(x.shape[0], x.shape[1], f_out)


if __name__ == "__main__":
    key = jax.random.PRNGKey(0)
    kx, kw, kb, kx2 = jax.random.split(key, 4)

    f_in, f_out = 32, 64
    weight = jax.random.normal(kw, (f_in, f_out), dtype=jnp.float32) * 0.05
    bias = jax.random.normal(kb, (f_out,), dtype=jnp.float32) * 0.01

    # --- 1) Small module-consistent shape (batch=2, seq=8), forced through the
    #        Pallas kernel, f32 end-to-end (default) for a tight numerical check.
    batch, seq = 2, 8
    x_small = jax.random.normal(kx, (batch, seq, f_in), dtype=jnp.float32)
    out_small = time_distributed_linear(x_small, weight, bias, force_kernel=True)
    out_small = jax.block_until_ready(out_small)
    ref_small = (x_small.reshape(batch * seq, f_in) @ weight + bias
                 ).reshape(batch, seq, f_out)
    assert out_small.shape == (batch, seq, f_out)
    assert jnp.allclose(out_small, ref_small, atol=1e-4, rtol=1e-4)

    # --- 2) Multi-step grid with a ragged tail block (m=1000, tm=256 -> 4 steps,
    #        last block partially out-of-range; writes dropped, no wrapper slice).
    batch2, seq2 = 4, 250
    x_rag = jax.random.normal(kx2, (batch2, seq2, f_in), dtype=jnp.float32)
    out_rag = time_distributed_linear(x_rag, weight, bias, tm=256, force_kernel=True)
    out_rag = jax.block_until_ready(out_rag)
    ref_rag = (x_rag.reshape(batch2 * seq2, f_in) @ weight + bias
               ).reshape(batch2, seq2, f_out)
    assert out_rag.shape == (batch2, seq2, f_out)
    assert jnp.allclose(out_rag, ref_rag, atol=1e-4, rtol=1e-4)

    # --- 3) Opt-in bf16 streaming path (in-kernel cast of x, f32 accumulation).
    out_bf16 = time_distributed_linear(x_rag, weight, bias, tm=256,
                                       compute_dtype=jnp.bfloat16,
                                       force_kernel=True)
    out_bf16 = jax.block_until_ready(out_bf16)
    max_err = float(jnp.max(jnp.abs(out_bf16.astype(jnp.float32) - ref_rag)))
    assert max_err < 5e-2, f"bf16 path error too large: {max_err}"

    print("KERNEL_OK")
</pallas_src>

<mosaic_0001>
module attributes {stable_mosaic.version = 11 : i64} {
  func.func @_td_linear_kernel(%arg0: i32, %arg1: memref<16x32xf32, #tpu.memory_space<vmem>>, %arg2: memref<32x64xf32, #tpu.memory_space<vmem>>, %arg3: memref<1x64xf32, #tpu.memory_space<vmem>>, %arg4: memref<16x64xf32, #tpu.memory_space<vmem>>) attributes {dimension_semantics = [#tpu.dimension_semantics<parallel>], iteration_bounds = array<i64: 1>, scalar_prefetch = 0 : i64, scratch_operands = 0 : i64, tpu.core_type = #tpu.core_type<tc>, window_params = [{transform_indices = @transform_0, window_bounds = array<i64: 16, 32>}, {pipeline_mode = #tpu.pipeline_mode<synchronous>, transform_indices = @transform_1, window_bounds = array<i64: 32, 64>}, {pipeline_mode = #tpu.pipeline_mode<synchronous>, transform_indices = @transform_2, window_bounds = array<i64: 1, 64>}, {transform_indices = @transform_3, window_bounds = array<i64: 16, 64>}]} {
    %c0 = arith.constant 0 : index
    %c0_0 = arith.constant 0 : index
    %0 = vector.load %arg1[%c0, %c0_0] : memref<16x32xf32, #tpu.memory_space<vmem>>, vector<16x32xf32>
    %c0_1 = arith.constant 0 : index
    %c0_2 = arith.constant 0 : index
    %1 = vector.load %arg2[%c0_1, %c0_2] : memref<32x64xf32, #tpu.memory_space<vmem>>, vector<32x64xf32>
    %cst = arith.constant dense<0.000000e+00> : vector<16x64xf32>
    %2 = tpu.matmul %0, %1, %cst {dimension_numbers = #tpu.dot_dimension_numbers<[1], [0], [0], [1], [0, 0, 1, 1], [], []>} : vector<16x32xf32>, vector<32x64xf32>, vector<16x64xf32> -> vector<16x64xf32>
    %c0_3 = arith.constant 0 : index
    %c0_4 = arith.constant 0 : index
    %3 = vector.load %arg3[%c0_3, %c0_4] : memref<1x64xf32, #tpu.memory_space<vmem>>, vector<1x64xf32>
    %4 = vector.broadcast %3 : vector<1x64xf32> to vector<16x64xf32>
    %5 = arith.addf %2, %4 : vector<16x64xf32>
    %c0_5 = arith.constant 0 : index
    %c0_6 = arith.constant 0 : index
    %6 = vector.load %arg4[%c0_5, %c0_6] : memref<16x64xf32, #tpu.memory_space<vmem>>, vector<16x64xf32>
    tpu.vector_store %arg4[%c0_5, %c0_6], %5 {strides = array<i32>} : memref<16x64xf32, #tpu.memory_space<vmem>>, vector<16x64xf32>,
    return
  }
  func.func @transform_0(%arg0: i32) -> (i32, i32) {
    %c0_i32 = arith.constant 0 : i32
    %c0_i32_0 = arith.constant 0 : i32
    return %arg0, %c0_i32 : i32, i32
  }
  func.func @transform_1(%arg0: i32) -> (i32, i32) {
    %c0_i32 = arith.constant 0 : i32
    %c0_i32_0 = arith.constant 0 : i32
    %c0_i32_1 = arith.constant 0 : i32
    return %c0_i32, %c0_i32_0 : i32, i32
  }
  func.func @transform_2(%arg0: i32) -> (i32, i32) {
    %c0_i32 = arith.constant 0 : i32
    %c0_i32_0 = arith.constant 0 : i32
    %c0_i32_1 = arith.constant 0 : i32
    return %c0_i32, %c0_i32_0 : i32, i32
  }
  func.func @transform_3(%arg0: i32) -> (i32, i32) {
    %c0_i32 = arith.constant 0 : i32
    %c0_i32_0 = arith.constant 0 : i32
    return %arg0, %c0_i32 : i32, i32
  }
}

</mosaic_0001>

<bundles_post_ra>
// kernel: tpu_custom_call.1
= control target key start
LH: loop header
LB: loop body
LE: loop exit
PB: predicated region body
PF: predicated region fallthrough
CT: control target
= control target key end

     0   :  { %8 = vsyncpa [#allocation3], 0  ;;  %s337_s0 = inlined_call_operand.hbm [shape: f32[16,32], index: 0, kind: input, shape index: {}]   ;;  %s338_s1 = inlined_call_operand.hbm [shape: f32[32,64], index: 1, kind: input, shape index: {}]   ;;  %s339_s2 = inlined_call_operand.vmem [shape: f32[1,64], index: 2, kind: input, shape index: {}]   ;;  %s340_s3 = inlined_call_operand.hbm [shape: f32[16,64], index: 3, kind: output, shape index: {}]  }
   0x1   :  { %9 = vsyncpa [#allocation6], 0 }
   0x2   :  { %10 = vsyncpa [#allocation4], 0  ;;  %s264_s12 = smov [#allocation2]   ;;  %s192_s16 = scalar_lea.hbm %s337_s0, 256 }
   0x3   :  { %s16_s13 = sshll.u32 %s264_s12, 4  ;;  %p193_p0 = scmp.ne.s32.totalorder %s337_s0, %s192_s16  ;;  %s17_s13 = int_to_ptr.vmem [resolvable:$true] %s16_s13 }
   0x4   :  { %p196_p1 = scmp.lt.u32.totalorder %s192_s16, %s337_s0 }
   0x6   :  { %p198_p2 = pnand %p196_p1, %p193_p0 }
   0x8   :  { %201 = shalt.err (!%p198_p2)
}
   0x9   :  { %s202_s21 = scalar_lea.vmem %s17_s13, 256  ;;  %p207_p4 = scmp.lt.s32.totalorder %s17_s13, %s17_s13 }
   0xa   :  { %p203_p3 = scmp.ne.s32.totalorder %s17_s13, %s202_s21  ;;  %p208_p5 = scmp.lt.s32.totalorder %s202_s21, %s202_s21 }
   0xc   :  { %p209_p6 = por %p208_p5, %p207_p4 }
   0xe   :  { %p210_p7 = pnand %p209_p6, %p203_p3 }
  0x10   :  { %213 = shalt.err (!%p210_p7)
}
  0x11   :  { %s265_s22 = smov 128   ;;  %s266_s23 = smov 8  }
  0x12   :  { %22 = dma.hbm_to_vmem [thread:$0]  %s337_s0, 256, %s17_s13, [#allocation3], %s265_s22, %s265_s22, %s266_s23  }
  0x13   :  { %s267_s26 = smov [#allocation5]   ;;  %s214_s30 = scalar_lea.hbm %s338_s1, 512 }
  0x14   :  { %s28_s27 = sshll.u32 %s267_s26, 4  ;;  %p215_p8 = scmp.ne.s32.totalorder %s338_s1, %s214_s30  ;;  %s29_s27 = int_to_ptr.vmem [resolvable:$true] %s28_s27 }
  0x15   :  { %p218_p9 = scmp.lt.u32.totalorder %s214_s30, %s338_s1 }
  0x17   :  { %p220_p10 = pnand %p218_p9, %p215_p8 }
  0x19   :  { %223 = shalt.err (!%p220_p10)
}
  0x1a   :  { %s224_s8 = scalar_lea.vmem %s29_s27, 512  ;;  %p229_p12 = scmp.lt.s32.totalorder %s29_s27, %s29_s27 }
  0x1b   :  { %p225_p11 = scmp.ne.s32.totalorder %s29_s27, %s224_s8  ;;  %p230_p13 = scmp.lt.s32.totalorder %s224_s8, %s224_s8 }
  0x1d   :  { %p231_p0 = por %p230_p13, %p229_p12 }
  0x1f   :  { %p232_p1 = pnand %p231_p0, %p225_p11 }
  0x21   :  { %235 = shalt.err (!%p232_p1)
}
  0x22   :  { %34 = dma.hbm_to_vmem [thread:$0]  %s338_s1, 512, %s29_s27, [#allocation6], %s265_s22, %s265_s22, %s266_s23  }
  0x23   :  { %258 = dma.done.wait [#allocation3], 256  }
  0x24   :  { %259 = vsyncadd [#allocation3], 4294967040 }
  0x25   :  { %260 = dma.done.wait [#allocation6], 512  }
  0x26   :  { %261 = vsyncadd [#allocation6], 4294966784  ;;  %vm56_vm0 = vcmask 261120   ;;  %v45_v0 = vld [vmem:[#allocation5] sm:$0xff]  ;;  %v46_v1 = vld [vmem:[#allocation5 + $0x8] sm:$0xff]  ;;  %s268_s11 = smov [#allocation7]  }
  0x27   :  { %v47_v2 = vld [vmem:[#allocation5 + $0x10] sm:$0xff]  ;;  %v179_v3 = vpack.c.bf16 %v46_v1, %v45_v0  ;;  %v48_v4 = vld [vmem:[#allocation5 + $0x18] sm:$0xff]  ;;  %s146_s12 = sshll.u32 %s268_s11, 4  ;;  %vm138_vm1 = vcmask 523264   ;;  %s147_s12 = int_to_ptr.vmem [resolvable:$true] %s146_s12 }
  0x28   :  { %v43_v5 = vld [vmem:[#allocation2] sm:$0xff]  ;;  %v183_v6 = vpack.c.bf16 %v48_v4, %v47_v2  ;;  %v44_v7 = vld [vmem:[#allocation2 + $0x8] sm:$0xff]  ;;  %s236_s13 = scalar_lea.vmem %s147_s12, 256  ;;  %p241_p3 = scmp.lt.s32.totalorder %s147_s12, %s147_s12 }
  0x29   :  { %176 = vmatprep.mubr.msk.f32.mxu0 %vm56_vm0, %v43_v5  ;;  %180 = vmatprep.subr.bf16.mxu0 %v179_v3  ;;  %v159_v8 = vld [vmem:[%s339_s2] ss:$0 sm:$0xff]  ;;  %p237_p2 = scmp.ne.s32.totalorder %s147_s12, %s236_s13  ;;  %p242_p4 = scmp.lt.s32.totalorder %s236_s13, %s236_s13 }
  0x2a   :  { %182 = vmatpush3.bf16.msra.mxu0 %v179_v3 }
  0x2b   :  { %184 = vmatprep.subr.bf16.mxu0 %v183_v6  ;;  %p243_p5 = por %p242_p4, %p241_p3 }
  0x2d   :  { %p244_p6 = pnand %p243_p5, %p237_p2 }
  0x2e   :  { %186 = vmatpush3.bf16.msra.mxu0 %v183_v6 }
  0x31   :  { %177 = vmatmul.mubr.msk.f32.vlgmr.msra.gmra.mrb[0].mxu0 %vm56_vm0, %v44_v7 }
 0x104   :  { %v178_v9 = vpop.f32.mrb[0].mxu0 }
 0x105   :  { %v135_v10 = vadd.f32 %v178_v9, %v159_v8  ;;  %v129_v11 = vpop.f32.mrb[1].mxu0 }
 0x106   :  { %v130_v12 = vadd.f32 %v159_v8, %v129_v11 }
 0x107   :  { %140 = vst.msk [vmem:[#allocation7 + $0x8] sm:$0xff] %vm138_vm1, %v135_v10 }
 0x108   :  { %139 = vst.msk [vmem:[#allocation7] sm:$0xff] %vm138_vm1, %v130_v12 }
 0x109   :  { %247 = shalt.err (!%p244_p6)
}
 0x10a   :  { %s248_s2 = scalar_lea.hbm %s340_s3, 256 }
 0x10b   :  { %p249_p7 = scmp.ne.s32.totalorder %s340_s3, %s248_s2  ;;  %p252_p8 = scmp.lt.u32.totalorder %s248_s2, %s340_s3 }
 0x10d   :  { %p254_p9 = pnand %p252_p8, %p249_p7 }
 0x10f   :  { %257 = shalt.err (!%p254_p9)
}
 0x110   :  { %152 = dma.vmem_to_hbm [thread:$0]  %s147_s12, 256, %s340_s3, [#allocation4], %s265_s22, %s265_s22, %s266_s23  }
 0x111   :  { %262 = dma.done.wait [#allocation4], 256  }
 0x112   :  { %263 = vsyncadd [#allocation4], 4294967040 }
 0x113   :  { %156 = vsyncpa [#allocation3], 1 }
 0x114   :  { %157 = vsyncpa [#allocation6], 1 }
 0x115   :  { %158 = vsyncpa [#allocation4], 1 }

</bundles_post_ra>
